<compile_context>
chip_gen: v5e
topology: v5e:2x2
jax: 0.10.0
libtpu: 0.0.40
codegen_flags: <defaults>
</compile_context>

<pallas_src>
import functools

import jax
import jax.numpy as jnp
from jax.experimental import pallas as pl
from jax.experimental.pallas import tpu as pltpu

LANE = 128
SUB = 8
NEG = -1e30  # additive mask for padded softmax / log-softmax columns


def _round_up(x, m):
    return ((x + m - 1) // m) * m


def _sigmoid(x):
    # Single EUP push per gate (tanh form); exact (no approx reciprocal) on
    # the GRU gating path.
    return 0.5 * jnp.tanh(0.5 * x) + 0.5


def decoder_kernel(emb_ref, h_ref, enc_ref, acw_ref, gw_ref, b_ref, out_ref,
                   *, Hp, Lp, Cp):
    """One attention-decoder step.

    emb_ref : (Bp, Hp)        f32  embedded token (zero-padded columns)
    h_ref   : (Bp, Hp)        f32  previous hidden state (zero-padded columns)
    enc_ref : (Bp*Lp, Hp)     bf16 encoder outputs, flattened (b, l)-major
    acw_ref : (2*Hp, Lp+Hp)   bf16 fused [attn | attn_combine] weights
    gw_ref  : (Hp, 6*Hp+Cp)   bf16 fused [W_ih | W_hh | W_out]
    b_ref   : (1, Lp+Hp+6*Hp+Cp) f32 fused biases (softmax pads hold -1e30)
    out_ref : (Bp, Cp+Hp+Lp)  f32  fused [log_softmax | h_new | attn] slab
    """
    Bp = emb_ref.shape[0]

    emb = emb_ref[...]
    h = h_ref[...]
    emb_b = emb.astype(jnp.bfloat16)
    h_b = h.astype(jnp.bfloat16)

    # Fused-bias static lane slices (free on the ref; 128-aligned offsets).
    off = 0
    attn_b = b_ref[:, off:off + Lp]; off += Lp
    comb_b = b_ref[:, off:off + Hp]; off += Hp
    b_ih = b_ref[:, off:off + 3 * Hp]; off += 3 * Hp
    b_hh = b_ref[:, off:off + 3 * Hp]; off += 3 * Hp
    out_b = b_ref[:, off:off + Cp]

    # --- attn_weights = softmax(attn(cat(embedded, hidden[0]))) over L ------
    # cat(emb, h) @ W == emb @ W[:H] + h @ W[H:]. Padded L columns carry a
    # -1e30 bias so they get exactly zero weight; the (Bp, Lp=128) result is
    # lane-dense for the output store.
    scores = (
        jnp.dot(emb_b, acw_ref[0:Hp, 0:Lp], preferred_element_type=jnp.float32)
        + jnp.dot(h_b, acw_ref[Hp:2 * Hp, 0:Lp],
                  preferred_element_type=jnp.float32)
        + attn_b)
    m = jnp.max(scores, axis=1, keepdims=True)
    e = jnp.exp(scores - m)
    attn = e / jnp.sum(e, axis=1, keepdims=True)   # exact: attn is an output

    # --- attn_applied[b] = attn[b, :] @ enc[b, :, :] -------------------------
    # One dense 2D MXU matmul: block-diagonal attention (Bp, Bp*Lp) against
    # the flattened (Bp*Lp, Hp) encoder outputs. Off-batch / padded entries
    # are exactly zero, so padded L columns and batch rows contribute nothing,
    # and the big (B, L, H) temporary never touches the VPU / vreg file.
    # TODO(synk): for large B switch to a per-batch chunked loop / batched
    #             einsum; the block-diagonal trick does Bp-fold redundant MXU
    #             work (negligible at these shapes).
    attn_cat = jnp.concatenate([attn] * Bp, axis=1)             # (Bp, Bp*Lp)
    col = jax.lax.broadcasted_iota(jnp.int32, (Bp, Bp * Lp), 1)
    row = jax.lax.broadcasted_iota(jnp.int32, (Bp, Bp * Lp), 0)
    in_block = (col >= row * Lp) & (col < (row + 1) * Lp)
    attn_bd = jnp.where(in_block, attn_cat, 0.0).astype(jnp.bfloat16)
    ctx = jnp.dot(attn_bd, enc_ref[...], preferred_element_type=jnp.float32)

    # --- relu(attn_combine(cat(embedded, context))) --------------------------
    x = (
        jnp.dot(emb_b, acw_ref[0:Hp, Lp:Lp + Hp],
                preferred_element_type=jnp.float32)
        + jnp.dot(ctx.astype(jnp.bfloat16), acw_ref[Hp:2 * Hp, Lp:Lp + Hp],
                  preferred_element_type=jnp.float32)
        + comb_b)
    x = jnp.maximum(x, 0.0)

    # --- single-step GRU (PyTorch gate order r, z, n; fused gate matmuls) ----
    gi = jnp.dot(x.astype(jnp.bfloat16), gw_ref[:, 0:3 * Hp],
                 preferred_element_type=jnp.float32) + b_ih
    gh = jnp.dot(h_b, gw_ref[:, 3 * Hp:6 * Hp],
                 preferred_element_type=jnp.float32) + b_hh
    r = _sigmoid(gi[:, 0:Hp] + gh[:, 0:Hp])
    z = _sigmoid(gi[:, Hp:2 * Hp] + gh[:, Hp:2 * Hp])
    n = jnp.tanh(gi[:, 2 * Hp:3 * Hp] + r * gh[:, 2 * Hp:3 * Hp])
    h_new = (1.0 - z) * n + z * h                    # padded cols stay 0

    # --- log_softmax(out(h_new)) over classes (padded cols biased -1e30) -----
    logits = jnp.dot(h_new.astype(jnp.bfloat16), gw_ref[:, 6 * Hp:6 * Hp + Cp],
                     preferred_element_type=jnp.float32) + out_b
    lm = jnp.max(logits, axis=1, keepdims=True)
    lse = jnp.log(jnp.sum(jnp.exp(logits - lm), axis=1, keepdims=True)) + lm

    # Lane-dense fused output slab: every store is a full, 128-aligned write.
    out_ref[:, 0:Cp] = logits - lse
    out_ref[:, Cp:Cp + Hp] = h_new
    out_ref[:, Cp + Hp:Cp + Hp + Lp] = attn


def init_raw_params(key, H, C, L):
    """Raw parameters in PyTorch layout (Linear weights are (out, in))."""
    ks = jax.random.split(key, 11)
    s = 0.1

    def rnd(k, shape):
        return jax.random.normal(k, shape, dtype=jnp.float32) * s

    return dict(
        embedding=rnd(ks[0], (C, H)),        # nn.Embedding(C, H).weight
        attn_w=rnd(ks[1], (L, 2 * H)),       # nn.Linear(2H, L).weight
        attn_b=rnd(ks[2], (L,)),
        comb_w=rnd(ks[3], (H, 2 * H)),       # nn.Linear(2H, H).weight
        comb_b=rnd(ks[4], (H,)),
        w_ih=rnd(ks[5], (3 * H, H)),         # GRU weight_ih_l0 (gates r,z,n)
        b_ih=rnd(ks[6], (3 * H,)),
        w_hh=rnd(ks[7], (3 * H, H)),         # GRU weight_hh_l0
        b_hh=rnd(ks[8], (3 * H,)),
        out_w=rnd(ks[9], (C, H)),            # nn.Linear(H, C).weight
        out_b=rnd(ks[10], (C,)),
    )


def pack_params(raw, H, C, L):
    """Pad to 128-lane tiles and fuse into 3 kernel operands (done once)."""
    f32, bf16 = jnp.float32, jnp.bfloat16
    Hp = _round_up(H, LANE)
    Lp = _round_up(L, LANE)
    Cp = _round_up(C, LANE)

    # attn: (L, 2H) -> (2H, L) -> (2Hp, Lp); rows for padded emb/h cols = 0.
    aw_t = raw['attn_w'].T
    aw = jnp.zeros((2 * Hp, Lp), f32)
    aw = aw.at[0:H, 0:L].set(aw_t[0:H])
    aw = aw.at[Hp:Hp + H, 0:L].set(aw_t[H:2 * H])
    ab = jnp.full((1, Lp), NEG, f32).at[0, 0:L].set(raw['attn_b'])

    # attn_combine: (H, 2H) -> (2H, H) -> (2Hp, Hp).
    cw_t = raw['comb_w'].T
    cw = jnp.zeros((2 * Hp, Hp), f32)
    cw = cw.at[0:H, 0:H].set(cw_t[0:H])
    cw = cw.at[Hp:Hp + H, 0:H].set(cw_t[H:2 * H])
    cb = jnp.zeros((1, Hp), f32).at[0, 0:H].set(raw['comb_b'])

    def pad_gru_w(w):                       # (3H, H) -> (Hp, 3Hp), per gate
        wt = w.T                            # (H, 3H)
        out = jnp.zeros((Hp, 3 * Hp), f32)
        for g in range(3):
            out = out.at[0:H, g * Hp:g * Hp + H].set(wt[:, g * H:(g + 1) * H])
        return out

    def pad_gru_b(b):                       # (3H,) -> (1, 3Hp)
        out = jnp.zeros((1, 3 * Hp), f32)
        for g in range(3):
            out = out.at[0, g * Hp:g * Hp + H].set(b[g * H:(g + 1) * H])
        return out

    wih, whh = pad_gru_w(raw['w_ih']), pad_gru_w(raw['w_hh'])
    bih, bhh = pad_gru_b(raw['b_ih']), pad_gru_b(raw['b_hh'])

    # output projection: (C, H) -> (Hp, Cp); padded classes biased to -1e30.
    ow = jnp.zeros((Hp, Cp), f32).at[0:H, 0:C].set(raw['out_w'].T)
    ob = jnp.full((1, Cp), NEG, f32).at[0, 0:C].set(raw['out_b'])

    emb_tab = jnp.zeros((C, Hp), f32).at[:, 0:H].set(raw['embedding'])

    return dict(
        nclass=C, Hp=Hp, Lp=Lp, Cp=Cp,
        embedding=emb_tab,                                          # (C, Hp) f32
        attn_comb_w=jnp.concatenate([aw, cw], axis=1).astype(bf16),  # (2Hp, Lp+Hp)
        gru_out_w=jnp.concatenate([wih, whh, ow], axis=1).astype(bf16),  # (Hp, 6Hp+Cp)
        biases=jnp.concatenate([ab, cb, bih, bhh, ob], axis=1),      # (1, Lp+Hp+6Hp+Cp)
    )


def decoder_forward(packed, tokens, hidden, encoder_outputs):
    """tokens: (B,) int32; hidden: (1, B, H); encoder_outputs: (L, B, H)."""
    B = tokens.shape[0]
    L, _, H = encoder_outputs.shape
    C = packed['nclass']
    Hp, Lp, Cp = packed['Hp'], packed['Lp'], packed['Cp']
    Bp = max(SUB, _round_up(B, SUB))      # full sublane occupancy

    # TODO(synk): gather tokens in-kernel (PrefetchScalarGridSpec + HBM table)
    #             once the autoregressive T loop moves inside the kernel.
    emb = packed['embedding'][tokens]                         # (B, Hp) f32
    emb = jnp.pad(emb, ((0, Bp - B), (0, 0)))

    h = jnp.pad(hidden[0], ((0, Bp - B), (0, Hp - H)))        # (Bp, Hp) f32

    enc = jnp.transpose(encoder_outputs, (1, 0, 2)).astype(jnp.bfloat16)
    enc = jnp.pad(enc, ((0, Bp - B), (0, Lp - L), (0, Hp - H)))
    enc2d = enc.reshape(Bp * Lp, Hp)                          # (Bp*Lp, Hp) bf16

    kernel = functools.partial(decoder_kernel, Hp=Hp, Lp=Lp, Cp=Cp)
    vmem = pl.BlockSpec(memory_space=pltpu.MemorySpace.VMEM)
    slab = pl.pallas_call(
        kernel,
        out_shape=jax.ShapeDtypeStruct((Bp, Cp + Hp + Lp), jnp.float32),
        in_specs=[vmem] * 6,
        out_specs=vmem,
    )(emb, h, enc2d, packed['attn_comb_w'], packed['gru_out_w'],
      packed['biases'])

    # Unfuse + strip padding; hidden back to (1, B, H).
    logp = slab[:B, 0:C]
    h_new = slab[:B, Cp:Cp + H][None]
    attn = slab[:B, Cp + Hp:Cp + Hp + L]
    return logp, h_new, attn


if __name__ == "__main__":
    # Small shapes consistent with the module's forward:
    B, H, C, L = 2, 32, 20, 16   # batch, hidden_size (nh), nclass, max_length
    key = jax.random.PRNGKey(0)
    kp, kt, ke = jax.random.split(key, 3)

    raw = init_raw_params(kp, H, C, L)
    packed = pack_params(raw, H, C, L)

    tokens = jax.random.randint(kt, (B,), 0, C, dtype=jnp.int32)       # `input`
    hidden = jnp.zeros((1, B, H), dtype=jnp.float32)                   # initHidden
    encoder_outputs = jax.random.normal(ke, (L, B, H), dtype=jnp.float32)

    fwd = jax.jit(functools.partial(decoder_forward, packed))
    logp, h_new, attn_w = fwd(tokens, hidden, encoder_outputs)
    jax.block_until_ready((logp, h_new, attn_w))

    assert logp.shape == (B, C)
    assert h_new.shape == (1, B, H)
    assert attn_w.shape == (B, L)
    assert bool(jnp.all(jnp.isfinite(logp)))
    assert bool(jnp.all(jnp.isfinite(attn_w)))
    print("KERNEL_OK")
</pallas_src>

<mosaic_0001>
module attributes {stable_mosaic.version = 11 : i64} {
  func.func @decoder_kernel(%arg0: memref<8x128xf32, #tpu.memory_space<vmem>>, %arg1: memref<8x128xf32, #tpu.memory_space<vmem>>, %arg2: memref<1024x128xbf16, #tpu.memory_space<vmem>>, %arg3: memref<256x256xbf16, #tpu.memory_space<vmem>>, %arg4: memref<128x896xbf16, #tpu.memory_space<vmem>>, %arg5: memref<1x1152xf32, #tpu.memory_space<vmem>>, %arg6: memref<8x384xf32, #tpu.memory_space<vmem>>) attributes {dimension_semantics = [], scalar_prefetch = 0 : i64, scratch_operands = 0 : i64, tpu.core_type = #tpu.core_type<tc>} {
    %c0 = arith.constant 0 : index
    %c0_0 = arith.constant 0 : index
    %0 = vector.load %arg0[%c0, %c0_0] : memref<8x128xf32, #tpu.memory_space<vmem>>, vector<8x128xf32>
    %c0_1 = arith.constant 0 : index
    %c0_2 = arith.constant 0 : index
    %1 = vector.load %arg1[%c0_1, %c0_2] : memref<8x128xf32, #tpu.memory_space<vmem>>, vector<8x128xf32>
    %2 = arith.truncf %0 : vector<8x128xf32> to vector<8x128xbf16>
    %3 = arith.truncf %1 : vector<8x128xf32> to vector<8x128xbf16>
    %c0_3 = arith.constant 0 : index
    %c0_4 = arith.constant 0 : index
    %4 = vector.load %arg5[%c0_3, %c0_4] : memref<1x1152xf32, #tpu.memory_space<vmem>>, vector<1x128xf32>
    %c0_5 = arith.constant 0 : index
    %c128 = arith.constant 128 : index
    %5 = vector.load %arg5[%c0_5, %c128] : memref<1x1152xf32, #tpu.memory_space<vmem>>, vector<1x128xf32>
    %c0_6 = arith.constant 0 : index
    %c256 = arith.constant 256 : index
    %6 = vector.load %arg5[%c0_6, %c256] : memref<1x1152xf32, #tpu.memory_space<vmem>>, vector<1x384xf32>
    %c0_7 = arith.constant 0 : index
    %c640 = arith.constant 640 : index
    %7 = vector.load %arg5[%c0_7, %c640] : memref<1x1152xf32, #tpu.memory_space<vmem>>, vector<1x384xf32>
    %c0_8 = arith.constant 0 : index
    %c1024 = arith.constant 1024 : index
    %8 = vector.load %arg5[%c0_8, %c1024] : memref<1x1152xf32, #tpu.memory_space<vmem>>, vector<1x128xf32>
    %c0_9 = arith.constant 0 : index
    %c0_10 = arith.constant 0 : index
    %9 = vector.load %arg3[%c0_9, %c0_10] : memref<256x256xbf16, #tpu.memory_space<vmem>>, vector<128x128xbf16>
    %cst = arith.constant dense<0.000000e+00> : vector<8x128xf32>
    %10 = tpu.matmul %2, %9, %cst {dimension_numbers = #tpu.dot_dimension_numbers<[1], [0], [0], [1], [0, 0, 1, 1], [], []>} : vector<8x128xbf16>, vector<128x128xbf16>, vector<8x128xf32> -> vector<8x128xf32>
    %c128_11 = arith.constant 128 : index
    %c0_12 = arith.constant 0 : index
    %11 = vector.load %arg3[%c128_11, %c0_12] : memref<256x256xbf16, #tpu.memory_space<vmem>>, vector<128x128xbf16>
    %cst_13 = arith.constant dense<0.000000e+00> : vector<8x128xf32>
    %12 = tpu.matmul %3, %11, %cst_13 {dimension_numbers = #tpu.dot_dimension_numbers<[1], [0], [0], [1], [0, 0, 1, 1], [], []>} : vector<8x128xbf16>, vector<128x128xbf16>, vector<8x128xf32> -> vector<8x128xf32>
    %13 = arith.addf %10, %12 : vector<8x128xf32>
    %14 = vector.broadcast %4 : vector<1x128xf32> to vector<8x128xf32>
    %15 = arith.addf %13, %14 : vector<8x128xf32>
    %cst_14 = arith.constant dense<0xFF800000> : vector<8xf32>
    %16 = vector.multi_reduction <maximumf>, %15, %cst_14 [1] : vector<8x128xf32> to vector<8xf32>
    %17 = vector.shape_cast %16 : vector<8xf32> to vector<8x1xf32>
    %18 = vector.broadcast %17 : vector<8x1xf32> to vector<8x128xf32>
    %19 = arith.subf %15, %18 : vector<8x128xf32>
    %20 = math.exp %19 : vector<8x128xf32>
    %cst_15 = arith.constant dense<0.000000e+00> : vector<8xf32>
    %21 = vector.multi_reduction <add>, %20, %cst_15 [1] : vector<8x128xf32> to vector<8xf32>
    %22 = vector.shape_cast %21 : vector<8xf32> to vector<8x1xf32>
    %23 = vector.broadcast %22 : vector<8x1xf32> to vector<8x128xf32>
    %24 = arith.divf %20, %23 : vector<8x128xf32>
    %25 = tpu.concatenate %24, %24, %24, %24, %24, %24, %24, %24 in 1 : vector<8x128xf32>, vector<8x128xf32>, vector<8x128xf32>, vector<8x128xf32>, vector<8x128xf32>, vector<8x128xf32>, vector<8x128xf32>, vector<8x128xf32> -> vector<8x1024xf32>
    %26 = tpu.iota {dimensions = array<i32: 1>} : vector<8x1024xi32>
    %27 = tpu.iota {dimensions = array<i32: 0>} : vector<8x1024xi32>
    %c128_i32 = arith.constant 128 : i32
    %28 = vector.broadcast %c128_i32 : i32 to vector<8x1024xi32>
    %29 = arith.muli %27, %28 : vector<8x1024xi32>
    %30 = arith.cmpi sge, %26, %29 : vector<8x1024xi32>
    %c1_i32 = arith.constant 1 : i32
    %31 = vector.broadcast %c1_i32 : i32 to vector<8x1024xi32>
    %32 = arith.addi %27, %31 : vector<8x1024xi32>
    %c128_i32_16 = arith.constant 128 : i32
    %33 = vector.broadcast %c128_i32_16 : i32 to vector<8x1024xi32>
    %34 = arith.muli %32, %33 : vector<8x1024xi32>
    %35 = arith.cmpi slt, %26, %34 : vector<8x1024xi32>
    %36 = arith.andi %30, %35 : vector<8x1024xi1>
    %cst_17 = arith.constant 0.000000e+00 : f32
    %37 = vector.broadcast %cst_17 : f32 to vector<8x1024xf32>
    %38 = arith.select %36, %25, %37 : vector<8x1024xi1>, vector<8x1024xf32>
    %39 = arith.truncf %38 : vector<8x1024xf32> to vector<8x1024xbf16>
    %c0_18 = arith.constant 0 : index
    %c0_19 = arith.constant 0 : index
    %40 = vector.load %arg2[%c0_18, %c0_19] : memref<1024x128xbf16, #tpu.memory_space<vmem>>, vector<1024x128xbf16>
    %cst_20 = arith.constant dense<0.000000e+00> : vector<8x128xf32>
    %41 = tpu.matmul %39, %40, %cst_20 {dimension_numbers = #tpu.dot_dimension_numbers<[1], [0], [0], [1], [0, 0, 1, 1], [], []>} : vector<8x1024xbf16>, vector<1024x128xbf16>, vector<8x128xf32> -> vector<8x128xf32>
    %c0_21 = arith.constant 0 : index
    %c128_22 = arith.constant 128 : index
    %42 = vector.load %arg3[%c0_21, %c128_22] : memref<256x256xbf16, #tpu.memory_space<vmem>>, vector<128x128xbf16>
    %cst_23 = arith.constant dense<0.000000e+00> : vector<8x128xf32>
    %43 = tpu.matmul %2, %42, %cst_23 {dimension_numbers = #tpu.dot_dimension_numbers<[1], [0], [0], [1], [0, 0, 1, 1], [], []>} : vector<8x128xbf16>, vector<128x128xbf16>, vector<8x128xf32> -> vector<8x128xf32>
    %44 = arith.truncf %41 : vector<8x128xf32> to vector<8x128xbf16>
    %c128_24 = arith.constant 128 : index
    %c128_25 = arith.constant 128 : index
    %45 = vector.load %arg3[%c128_24, %c128_25] : memref<256x256xbf16, #tpu.memory_space<vmem>>, vector<128x128xbf16>
    %cst_26 = arith.constant dense<0.000000e+00> : vector<8x128xf32>
    %46 = tpu.matmul %44, %45, %cst_26 {dimension_numbers = #tpu.dot_dimension_numbers<[1], [0], [0], [1], [0, 0, 1, 1], [], []>} : vector<8x128xbf16>, vector<128x128xbf16>, vector<8x128xf32> -> vector<8x128xf32>
    %47 = arith.addf %43, %46 : vector<8x128xf32>
    %48 = vector.broadcast %5 : vector<1x128xf32> to vector<8x128xf32>
    %49 = arith.addf %47, %48 : vector<8x128xf32>
    %cst_27 = arith.constant 0.000000e+00 : f32
    %50 = vector.broadcast %cst_27 : f32 to vector<8x128xf32>
    %51 = arith.maximumf %49, %50 : vector<8x128xf32>
    %52 = arith.truncf %51 : vector<8x128xf32> to vector<8x128xbf16>
    %c0_28 = arith.constant 0 : index
    %c0_29 = arith.constant 0 : index
    %53 = vector.load %arg4[%c0_28, %c0_29] : memref<128x896xbf16, #tpu.memory_space<vmem>>, vector<128x384xbf16>
    %cst_30 = arith.constant dense<0.000000e+00> : vector<8x384xf32>
    %54 = tpu.matmul %52, %53, %cst_30 {dimension_numbers = #tpu.dot_dimension_numbers<[1], [0], [0], [1], [0, 0, 1, 1], [], []>} : vector<8x128xbf16>, vector<128x384xbf16>, vector<8x384xf32> -> vector<8x384xf32>
    %55 = vector.broadcast %6 : vector<1x384xf32> to vector<8x384xf32>
    %56 = arith.addf %54, %55 : vector<8x384xf32>
    %c0_31 = arith.constant 0 : index
    %c384 = arith.constant 384 : index
    %57 = vector.load %arg4[%c0_31, %c384] : memref<128x896xbf16, #tpu.memory_space<vmem>>, vector<128x384xbf16>
    %cst_32 = arith.constant dense<0.000000e+00> : vector<8x384xf32>
    %58 = tpu.matmul %3, %57, %cst_32 {dimension_numbers = #tpu.dot_dimension_numbers<[1], [0], [0], [1], [0, 0, 1, 1], [], []>} : vector<8x128xbf16>, vector<128x384xbf16>, vector<8x384xf32> -> vector<8x384xf32>
    %59 = vector.broadcast %7 : vector<1x384xf32> to vector<8x384xf32>
    %60 = arith.addf %58, %59 : vector<8x384xf32>
    %61 = vector.extract_strided_slice %56 {offsets = [0, 0], sizes = [8, 128], strides = [1, 1]} : vector<8x384xf32> to vector<8x128xf32>
    %62 = vector.extract_strided_slice %60 {offsets = [0, 0], sizes = [8, 128], strides = [1, 1]} : vector<8x384xf32> to vector<8x128xf32>
    %63 = arith.addf %61, %62 : vector<8x128xf32>
    %cst_33 = arith.constant 5.000000e-01 : f32
    %64 = vector.broadcast %cst_33 : f32 to vector<8x128xf32>
    %65 = arith.mulf %64, %63 : vector<8x128xf32>
    %66 = math.tanh %65 : vector<8x128xf32>
    %cst_34 = arith.constant 5.000000e-01 : f32
    %67 = vector.broadcast %cst_34 : f32 to vector<8x128xf32>
    %68 = arith.mulf %67, %66 : vector<8x128xf32>
    %cst_35 = arith.constant 5.000000e-01 : f32
    %69 = vector.broadcast %cst_35 : f32 to vector<8x128xf32>
    %70 = arith.addf %68, %69 : vector<8x128xf32>
    %71 = vector.extract_strided_slice %56 {offsets = [0, 128], sizes = [8, 128], strides = [1, 1]} : vector<8x384xf32> to vector<8x128xf32>
    %72 = vector.extract_strided_slice %60 {offsets = [0, 128], sizes = [8, 128], strides = [1, 1]} : vector<8x384xf32> to vector<8x128xf32>
    %73 = arith.addf %71, %72 : vector<8x128xf32>
    %cst_36 = arith.constant 5.000000e-01 : f32
    %74 = vector.broadcast %cst_36 : f32 to vector<8x128xf32>
    %75 = arith.mulf %74, %73 : vector<8x128xf32>
    %76 = math.tanh %75 : vector<8x128xf32>
    %cst_37 = arith.constant 5.000000e-01 : f32
    %77 = vector.broadcast %cst_37 : f32 to vector<8x128xf32>
    %78 = arith.mulf %77, %76 : vector<8x128xf32>
    %cst_38 = arith.constant 5.000000e-01 : f32
    %79 = vector.broadcast %cst_38 : f32 to vector<8x128xf32>
    %80 = arith.addf %78, %79 : vector<8x128xf32>
    %81 = vector.extract_strided_slice %56 {offsets = [0, 256], sizes = [8, 128], strides = [1, 1]} : vector<8x384xf32> to vector<8x128xf32>
    %82 = vector.extract_strided_slice %60 {offsets = [0, 256], sizes = [8, 128], strides = [1, 1]} : vector<8x384xf32> to vector<8x128xf32>
    %83 = arith.mulf %70, %82 : vector<8x128xf32>
    %84 = arith.addf %81, %83 : vector<8x128xf32>
    %85 = math.tanh %84 : vector<8x128xf32>
    %cst_39 = arith.constant 1.000000e+00 : f32
    %86 = vector.broadcast %cst_39 : f32 to vector<8x128xf32>
    %87 = arith.subf %86, %80 : vector<8x128xf32>
    %88 = arith.mulf %87, %85 : vector<8x128xf32>
    %89 = arith.mulf %80, %1 : vector<8x128xf32>
    %90 = arith.addf %88, %89 : vector<8x128xf32>
    %91 = arith.truncf %90 : vector<8x128xf32> to vector<8x128xbf16>
    %c0_40 = arith.constant 0 : index
    %c768 = arith.constant 768 : index
    %92 = vector.load %arg4[%c0_40, %c768] : memref<128x896xbf16, #tpu.memory_space<vmem>>, vector<128x128xbf16>
    %cst_41 = arith.constant dense<0.000000e+00> : vector<8x128xf32>
    %93 = tpu.matmul %91, %92, %cst_41 {dimension_numbers = #tpu.dot_dimension_numbers<[1], [0], [0], [1], [0, 0, 1, 1], [], []>} : vector<8x128xbf16>, vector<128x128xbf16>, vector<8x128xf32> -> vector<8x128xf32>
    %94 = vector.broadcast %8 : vector<1x128xf32> to vector<8x128xf32>
    %95 = arith.addf %93, %94 : vector<8x128xf32>
    %cst_42 = arith.constant dense<0xFF800000> : vector<8xf32>
    %96 = vector.multi_reduction <maximumf>, %95, %cst_42 [1] : vector<8x128xf32> to vector<8xf32>
    %97 = vector.shape_cast %96 : vector<8xf32> to vector<8x1xf32>
    %98 = vector.broadcast %97 : vector<8x1xf32> to vector<8x128xf32>
    %99 = arith.subf %95, %98 : vector<8x128xf32>
    %100 = math.exp %99 : vector<8x128xf32>
    %cst_43 = arith.constant dense<0.000000e+00> : vector<8xf32>
    %101 = vector.multi_reduction <add>, %100, %cst_43 [1] : vector<8x128xf32> to vector<8xf32>
    %102 = vector.shape_cast %101 : vector<8xf32> to vector<8x1xf32>
    %103 = math.log %102 : vector<8x1xf32>
    %104 = arith.addf %103, %97 : vector<8x1xf32>
    %105 = vector.broadcast %104 : vector<8x1xf32> to vector<8x128xf32>
    %106 = arith.subf %95, %105 : vector<8x128xf32>
    %c0_44 = arith.constant 0 : index
    %c0_45 = arith.constant 0 : index
    %107 = vector.load %arg6[%c0_44, %c0_45] : memref<8x384xf32, #tpu.memory_space<vmem>>, vector<8x128xf32>
    tpu.vector_store %arg6[%c0_44, %c0_45], %106 {strides = array<i32>} : memref<8x384xf32, #tpu.memory_space<vmem>>, vector<8x128xf32>,
    %c0_46 = arith.constant 0 : index
    %c128_47 = arith.constant 128 : index
    %108 = vector.load %arg6[%c0_46, %c128_47] : memref<8x384xf32, #tpu.memory_space<vmem>>, vector<8x128xf32>
    tpu.vector_store %arg6[%c0_46, %c128_47], %90 {strides = array<i32>} : memref<8x384xf32, #tpu.memory_space<vmem>>, vector<8x128xf32>,
    %c0_48 = arith.constant 0 : index
    %c256_49 = arith.constant 256 : index
    %109 = vector.load %arg6[%c0_48, %c256_49] : memref<8x384xf32, #tpu.memory_space<vmem>>, vector<8x128xf32>
    tpu.vector_store %arg6[%c0_48, %c256_49], %24 {strides = array<i32>} : memref<8x384xf32, #tpu.memory_space<vmem>>, vector<8x128xf32>,
    return
  }
}

</mosaic_0001>

<bundles_post_ra>
// kernel: decoder_forward.1
= control target key start
LH: loop header
LB: loop body
LE: loop exit
PB: predicated region body
PF: predicated region fallthrough
CT: control target
= control target key end

     0   :  { %11 = vsyncpa [#allocation3], 0  ;;  %s2419_s24 = smov [#allocation2]   ;;  %s2420_s26 = smov 128   ;;  %s3101_s0 = inlined_call_operand.vmem [shape: f32[8,128], index: 0, kind: input, shape index: {}]   ;;  %s3102_s1 = inlined_call_operand.vmem [shape: f32[8,128], index: 1, kind: input, shape index: {}]   ;;  %s3103_s2 = inlined_call_operand.vmem [shape: bf16[1024,128], index: 2, kind: input, shape index: {}]   ;;  %s3104_s3 = inlined_call_operand.hbm [shape: bf16[256,256], index: 3, kind: input, shape index: {}]   ;;  %s3105_s4 = inlined_call_operand.vmem [shape: bf16[128,896], index: 4, kind: input, shape index: {}]   ;;  %s3106_s5 = inlined_call_operand.vmem [shape: f32[1,1152], index: 5, kind: input, shape index: {}]   ;;  %s3107_s6 = inlined_call_operand.vmem [shape: f32[8,384], index: 6, kind: output, shape index: {}]  }
   0x1   :  { %s22_s23 = sshll.u32 %s3104_s3, 4  ;;  %s24_s25 = sshll.u32 %s2419_s24, 4  ;;  %s23_s23 = int_to_ptr.hbm [resolvable:$true] %s22_s23  ;;  %s25_s25 = int_to_ptr.vmem [resolvable:$true] %s24_s25 }
   0x2   :  { %s2421_s27 = smov 8  }
   0x3   :  { %30 = dma.hbm_to_vmem [thread:$0]  %s23_s23, 4096, %s25_s25, [#allocation3], %s2420_s26, %s2420_s26, %s2421_s27  }
   0x4   :  { %2417 = dma.done.wait [#allocation3], 4096  }
   0x5   :  { %2418 = vsyncadd [#allocation3], 4294963200  ;;  %v1618_v0 = vld [vmem:[#allocation2 + $0xf0] sm:$0xf]  ;;  %v2235_v1 = vld [vmem:[#allocation2 + $0xf4] sm:$0xf0] }
   0x6   :  { %v1650_v2 = vld [vmem:[#allocation2 + $0x70] sm:$0xf]  ;;  %v1619_v3 = vor.u32 %v2235_v1, %v1618_v0  ;;  %v2227_v4 = vld [vmem:[#allocation2 + $0x74] sm:$0xf0]  ;;  %v1614_v5 = vld [vmem:[#allocation2 + $0xe0] sm:$0xf] }
   0x7   :  { %v2234_v6 = vld [vmem:[#allocation2 + $0xe4] sm:$0xf0]  ;;  %v1651_v7 = vor.u32 %v2227_v4, %v1650_v2  ;;  %v1646_v8 = vld [vmem:[#allocation2 + $0x60] sm:$0xf]  ;;  %v1610_v12 = vld [vmem:[#allocation2 + $0xd0] sm:$0xf] }
   0x8   :  { %v2226_v9 = vld [vmem:[#allocation2 + $0x64] sm:$0xf0]  ;;  %128 = vmatpush.bf16.msra.mxu0 %v1619_v3  ;;  %v1615_v10 = vor.u32 %v2234_v6, %v1614_v5  ;;  %v2233_v13 = vld [vmem:[#allocation2 + $0xd4] sm:$0xf0]  ;;  %v1642_v14 = vld [vmem:[#allocation2 + $0x50] sm:$0xf] }
   0x9   :  { %189 = vmatpush.bf16.msra.mxu1 %v1651_v7  ;;  %v1647_v11 = vor.u32 %v2226_v9, %v1646_v8  ;;  %v2225_v15 = vld [vmem:[#allocation2 + $0x54] sm:$0xf0]  ;;  %v1611_v16 = vor.u32 %v2233_v13, %v1610_v12  ;;  %v1606_v18 = vld [vmem:[#allocation2 + $0xc0] sm:$0xf]  ;;  %v2232_v19 = vld [vmem:[#allocation2 + $0xc4] sm:$0xf0] }
   0xa   :  { %v1643_v17 = vor.u32 %v2225_v15, %v1642_v14  ;;  %v1638_v20 = vld [vmem:[#allocation2 + $0x40] sm:$0xf]  ;;  %v2224_v21 = vld [vmem:[#allocation2 + $0x44] sm:$0xf0]  ;;  %v1607_v22 = vor.u32 %v2232_v19, %v1606_v18  ;;  %v1602_v24 = vld [vmem:[#allocation2 + $0xb0] sm:$0xf] }
   0xb   :  { %v1639_v23 = vor.u32 %v2224_v21, %v1638_v20  ;;  %v2231_v25 = vld [vmem:[#allocation2 + $0xb4] sm:$0xf0]  ;;  %v1634_v26 = vld [vmem:[#allocation2 + $0x30] sm:$0xf]  ;;  %v1598_v30 = vld [vmem:[#allocation2 + $0xa0] sm:$0xf] }
   0xc   :  { %129 = vmatpush.bf16.msra.mxu0 %v1615_v10  ;;  %v2223_v27 = vld [vmem:[#allocation2 + $0x34] sm:$0xf0]  ;;  %v1603_v28 = vor.u32 %v2231_v25, %v1602_v24  ;;  %v2230_v31 = vld [vmem:[#allocation2 + $0xa4] sm:$0xf0]  ;;  %v1630_v32 = vld [vmem:[#allocation2 + $0x20] sm:$0xf] }
   0xd   :  { %190 = vmatpush.bf16.msra.mxu1 %v1647_v11  ;;  %v1635_v29 = vor.u32 %v2223_v27, %v1634_v26  ;;  %v2222_v33 = vld [vmem:[#allocation2 + $0x24] sm:$0xf0]  ;;  %v1599_v34 = vor.u32 %v2230_v31, %v1598_v30  ;;  %v1594_v36 = vld [vmem:[#allocation2 + $0x90] sm:$0xf]  ;;  %v2229_v37 = vld [vmem:[#allocation2 + $0x94] sm:$0xf0] }
   0xe   :  { %v1631_v35 = vor.u32 %v2222_v33, %v1630_v32  ;;  %v1626_v38 = vld [vmem:[#allocation2 + $0x10] sm:$0xf]  ;;  %v2221_v39 = vld [vmem:[#allocation2 + $0x14] sm:$0xf0]  ;;  %v1595_v40 = vor.u32 %v2229_v37, %v1594_v36  ;;  %v1590_v42 = vld [vmem:[#allocation2 + $0x80] sm:$0xf] }
   0xf   :  { %v1627_v41 = vor.u32 %v2221_v39, %v1626_v38  ;;  %v2228_v43 = vld [vmem:[#allocation2 + $0x84] sm:$0xf0]  ;;  %v1622_v44 = vld [vmem:[#allocation2] sm:$0xf]  ;;  %v2243_v59 = vld [vmem:[%s3103_s2 + $0x38] sm:$0xff] }
  0x10   :  { %130 = vmatpush.bf16.msra.mxu0 %v1611_v16  ;;  %v2220_v45 = vld [vmem:[#allocation2 + $0x4] sm:$0xf0]  ;;  %v1591_v46 = vor.u32 %v2228_v43, %v1590_v42  ;;  %v40_v47 = vld [vmem:[%s3102_s1] sm:$0xff]  ;;  %v2251_v60 = vld [vmem:[%s3103_s2 + $0x78] sm:$0xff]  ;;  %794 = vmatpush.bf16.msra.mxu2 %v2243_v59 }
  0x11   :  { %191 = vmatpush.bf16.msra.mxu1 %v1643_v17  ;;  %v1623_v48 = vor.u32 %v2220_v45, %v1622_v44  ;;  %v39_v49 = vld [vmem:[%s3101_s0] sm:$0xff]  ;;  %v2466_v50 = vpack.c.bf16 %v40_v47, %v40_v47  ;;  %v2259_v61 = vld [vmem:[%s3103_s2 + $0xb8] sm:$0xff]  ;;  %807 = vmatpush.bf16.msra.mxu3 %v2251_v60  ;;  %v2242_v63 = vld [vmem:[%s3103_s2 + $0x30] sm:$0xff] }
  0x12   :  { %v2468_v51 = vpack.c.bf16 %v39_v49, %v39_v49  ;;  %v2375_v53 = vld [vmem:[%s3106_s5] ss:$0 sm:$0xff]  ;;  %v2267_v62 = vld [vmem:[%s3103_s2 + $0xf8] sm:$0xff]  ;;  %v2250_v0 = vld [vmem:[%s3103_s2 + $0x70] sm:$0xff]  ;;  %v228_v49 = vlaneseq }
  0x13   :  { %v2258_v1 = vld [vmem:[%s3103_s2 + $0xb0] sm:$0xff]  ;;  %v2241_v3 = vld [vmem:[%s3103_s2 + $0x28] sm:$0xff]  ;;  %v2240_v7 = vld [vmem:[%s3103_s2 + $0x20] sm:$0xff] }
  0x14   :  { %131 = vmatpush.bf16.msra.mxu0 %v1607_v22  ;;  %v2266_v2 = vld [vmem:[%s3103_s2 + $0xf0] sm:$0xff]  ;;  %795 = vmatpush.bf16.msra.mxu2 %v2242_v63  ;;  %v2249_v4 = vld [vmem:[%s3103_s2 + $0x68] sm:$0xff]  ;;  %v2248_v8 = vld [vmem:[%s3103_s2 + $0x60] sm:$0xff] }
  0x15   :  { %192 = vmatpush.bf16.msra.mxu1 %v1639_v23  ;;  %808 = vmatpush.bf16.msra.mxu3 %v2250_v0  ;;  %v2257_v5 = vld [vmem:[%s3103_s2 + $0xa8] sm:$0xff]  ;;  %v2256_v9 = vld [vmem:[%s3103_s2 + $0xa0] sm:$0xff]  ;;  %v2239_v11 = vld [vmem:[%s3103_s2 + $0x18] sm:$0xff] }
  0x16   :  { %v2265_v6 = vld [vmem:[%s3103_s2 + $0xe8] sm:$0xff]  ;;  %v2264_v10 = vld [vmem:[%s3103_s2 + $0xe0] sm:$0xff]  ;;  %v2247_v12 = vld [vmem:[%s3103_s2 + $0x58] sm:$0xff] }
  0x17   :  { %v2255_v13 = vld [vmem:[%s3103_s2 + $0x98] sm:$0xff]  ;;  %v2238_v15 = vld [vmem:[%s3103_s2 + $0x10] sm:$0xff]  ;;  %v2237_v23 = vld [vmem:[%s3103_s2 + $0x8] sm:$0xff] }
  0x18   :  { %132 = vmatpush.bf16.msra.mxu0 %v1603_v28  ;;  %796 = vmatpush.bf16.msra.mxu2 %v2241_v3  ;;  %v2263_v14 = vld [vmem:[%s3103_s2 + $0xd8] sm:$0xff]  ;;  %v2246_v16 = vld [vmem:[%s3103_s2 + $0x50] sm:$0xff]  ;;  %v2245_v24 = vld [vmem:[%s3103_s2 + $0x48] sm:$0xff] }
  0x19   :  { %193 = vmatpush.bf16.msra.mxu1 %v1635_v29  ;;  %809 = vmatpush.bf16.msra.mxu3 %v2249_v4  ;;  %v2254_v17 = vld [vmem:[%s3103_s2 + $0x90] sm:$0xff]  ;;  %v2253_v25 = vld [vmem:[%s3103_s2 + $0x88] sm:$0xff]  ;;  %v2236_v27 = vld [vmem:[%s3103_s2] sm:$0xff] }
  0x1a   :  { %v2262_v18 = vld [vmem:[%s3103_s2 + $0xd0] sm:$0xff]  ;;  %v2261_v26 = vld [vmem:[%s3103_s2 + $0xc8] sm:$0xff]  ;;  %v2244_v28 = vld [vmem:[%s3103_s2 + $0x40] sm:$0xff] }
  0x1b   :  { %v2252_v29 = vld [vmem:[%s3103_s2 + $0x80] sm:$0xff]  ;;  %v2275_v31 = vld [vmem:[%s3103_s2 + $0x138] sm:$0xff]  ;;  %v2282_v36 = vld [vmem:[%s3103_s2 + $0x170] sm:$0xff] }
  0x1c   :  { %133 = vmatpush.bf16.msra.mxu0 %v1599_v34  ;;  %797 = vmatpush.bf16.msra.mxu2 %v2240_v7  ;;  %v2260_v30 = vld [vmem:[%s3103_s2 + $0xc0] sm:$0xff]  ;;  %v2283_v32 = vld [vmem:[%s3103_s2 + $0x178] sm:$0xff]  ;;  %v2290_v37 = vld [vmem:[%s3103_s2 + $0x1b0] sm:$0xff] }
  0x1d   :  { %194 = vmatpush.bf16.msra.mxu1 %v1631_v35  ;;  %810 = vmatpush.bf16.msra.mxu3 %v2248_v8  ;;  %v2291_v33 = vld [vmem:[%s3103_s2 + $0x1b8] sm:$0xff]  ;;  %v2274_v35 = vld [vmem:[%s3103_s2 + $0x130] sm:$0xff]  ;;  %v2273_v39 = vld [vmem:[%s3103_s2 + $0x128] sm:$0xff] }
  0x1e   :  { %v2299_v34 = vld [vmem:[%s3103_s2 + $0x1f8] sm:$0xff]  ;;  %v2298_v38 = vld [vmem:[%s3103_s2 + $0x1f0] sm:$0xff]  ;;  %v2297_v42 = vld [vmem:[%s3103_s2 + $0x1e8] sm:$0xff] }
  0x1f   :  { %v2272_v43 = vld [vmem:[%s3103_s2 + $0x120] sm:$0xff]  ;;  %v2271_v47 = vld [vmem:[%s3103_s2 + $0x118] sm:$0xff]  ;;  %v2269_v59 = vld [vmem:[%s3103_s2 + $0x108] sm:$0xff] }
  0x20   :  { %134 = vmatpush.bf16.msra.mxu0 %v1595_v40  ;;  %798 = vmatpush.bf16.msra.mxu2 %v2239_v11  ;;  %v2281_v40 = vld [vmem:[%s3103_s2 + $0x168] sm:$0xff]  ;;  %v2280_v44 = vld [vmem:[%s3103_s2 + $0x160] sm:$0xff] }
  0x21   :  { %195 = vmatpush.bf16.msra.mxu1 %v1627_v41  ;;  %811 = vmatpush.bf16.msra.mxu3 %v2247_v12  ;;  %v2289_v41 = vld [vmem:[%s3103_s2 + $0x1a8] sm:$0xff]  ;;  %v2288_v45 = vld [vmem:[%s3103_s2 + $0x1a0] sm:$0xff] }
  0x22   :  { %v2277_v60 = vld [vmem:[%s3103_s2 + $0x148] sm:$0xff]  ;;  %v2284_v3 = vld [vmem:[%s3103_s2 + $0x180] sm:$0xff] }
  0x23   :  { %v2292_v4 = vld [vmem:[%s3103_s2 + $0x1c0] sm:$0xff] }
  0x24   :  { %135 = vmatpush.bf16.msra.mxu0 %v1591_v46  ;;  %799 = vmatpush.bf16.msra.mxu2 %v2238_v15  ;;  %v2296_v46 = vld [vmem:[%s3103_s2 + $0x1e0] sm:$0xff] }
  0x25   :  { %196 = vmatpush.bf16.msra.mxu1 %v1623_v48  ;;  %812 = vmatpush.bf16.msra.mxu3 %v2246_v16  ;;  %v2279_v48 = vld [vmem:[%s3103_s2 + $0x158] sm:$0xff] }
  0x27   :  { %136 = vmatmul.bf16.vlgmr.msra.gmra.mxu0 %v2466_v50 }
  0x28   :  { %197 = vmatmul.bf16.vlgmr.msra.gmra.mxu1 %v2468_v51  ;;  %820 = vmatpush.bf16.msrb.mxu0 %v2259_v61  ;;  %v2285_v61 = vld [vmem:[%s3103_s2 + $0x188] sm:$0xff] }
  0x29   :  { %833 = vmatpush.bf16.msrb.mxu1 %v2267_v62  ;;  %800 = vmatpush.bf16.msra.mxu2 %v2237_v23  ;;  %v2293_v62 = vld [vmem:[%s3103_s2 + $0x1c8] sm:$0xff] }
  0x2a   :  { %813 = vmatpush.bf16.msra.mxu3 %v2245_v24 }
  0x2c   :  { %821 = vmatpush.bf16.msrb.mxu0 %v2258_v1  ;;  %v2268_v1 = vld [vmem:[%s3103_s2 + $0x100] sm:$0xff] }
  0x2d   :  { %834 = vmatpush.bf16.msrb.mxu1 %v2266_v2  ;;  %801 = vmatpush.bf16.msra.mxu2 %v2236_v27  ;;  %v2276_v2 = vld [vmem:[%s3103_s2 + $0x140] sm:$0xff]  ;;  %v2307_v27 = vld [vmem:[#allocation2 + $0x78] sm:$0xf0] }
  0x2e   :  { %814 = vmatpush.bf16.msra.mxu3 %v2244_v28 }
  0x30   :  { %822 = vmatpush.bf16.msrb.mxu0 %v2257_v5  ;;  %v229_v5 = vand.u32 127, %v228_v49 }
  0x31   :  { %835 = vmatpush.bf16.msrb.mxu1 %v2265_v6  ;;  %846 = vmatpush.bf16.msrb.mxu2 %v2275_v31 }
  0x32   :  { %859 = vmatpush.bf16.msrb.mxu3 %v2283_v32  ;;  %v231_v11 = vadd.s32 256, %v229_v5  ;;  %v2306_v32 = vld [vmem:[#allocation2 + $0x68] sm:$0xf0] }
  0x34   :  { %823 = vmatpush.bf16.msrb.mxu0 %v2256_v9  ;;  %v230_v9 = vadd.s32 128, %v229_v5 }
  0x35   :  { %836 = vmatpush.bf16.msrb.mxu1 %v2264_v10  ;;  %847 = vmatpush.bf16.msrb.mxu2 %v2274_v35  ;;  %v235_v35 = vadd.s32 768, %v229_v5 }
  0x36   :  { %860 = vmatpush.bf16.msrb.mxu3 %v2282_v36  ;;  %v236_v36 = vadd.s32 896, %v229_v5 }
  0x38   :  { %824 = vmatpush.bf16.msrb.mxu0 %v2255_v13  ;;  %v2309_v13 = vld [vmem:[#allocation2 + $0x98] sm:$0xf0] }
  0x39   :  { %837 = vmatpush.bf16.msrb.mxu1 %v2263_v14  ;;  %848 = vmatpush.bf16.msrb.mxu2 %v2273_v39  ;;  %v232_v14 = vadd.s32 384, %v229_v5  ;;  %v2315_v39 = vld [vmem:[#allocation2 + $0xf8] sm:$0xf0] }
  0x3a   :  { %861 = vmatpush.bf16.msrb.mxu3 %v2281_v40  ;;  %v1986_v40 = vld [vmem:[#allocation2 + $0x54] sm:$0xf] }
  0x3c   :  { %825 = vmatpush.bf16.msrb.mxu0 %v2254_v17 }
  0x3d   :  { %838 = vmatpush.bf16.msrb.mxu1 %v2262_v18  ;;  %849 = vmatpush.bf16.msrb.mxu2 %v2272_v43 }
  0x3e   :  { %862 = vmatpush.bf16.msrb.mxu3 %v2280_v44  ;;  %v1958_v44 = vld [vmem:[#allocation2 + $0xe4] sm:$0xf] }
  0x40   :  { %826 = vmatpush.bf16.msrb.mxu0 %v2253_v25  ;;  %v2070_v25 = vld [vmem:[%s3105_s4 + $0x150] sm:$0xf] }
  0x41   :  { %839 = vmatpush.bf16.msrb.mxu1 %v2261_v26  ;;  %850 = vmatpush.bf16.msrb.mxu2 %v2271_v47  ;;  %v1994_v26 = vld [vmem:[#allocation2 + $0x74] sm:$0xf] }
  0x42   :  { %863 = vmatpush.bf16.msrb.mxu3 %v2279_v48  ;;  %v1995_v31 = vor.u32 %v2307_v27, %v1994_v26  ;;  %v2304_v48 = vld [vmem:[#allocation2 + $0x48] sm:$0xf0] }
  0x43   :  { %v2335_v26 = vld [vmem:[%s3105_s4 + $0x168] sm:$0xf0] }
  0x44   :  { %827 = vmatpush.bf16.msrb.mxu0 %v2252_v29 }
  0x45   :  { %840 = vmatpush.bf16.msrb.mxu1 %v2260_v30  ;;  %v233_v30 = vadd.s32 512, %v229_v5 }
  0x48   :  { %872 = vmatpush.bf16.msra.mxu0 %v2291_v33  ;;  %v234_v33 = vadd.s32 640, %v229_v5 }
  0x49   :  { %885 = vmatpush.bf16.msra.mxu1 %v2299_v34 }
  0x4c   :  { %873 = vmatpush.bf16.msra.mxu0 %v2290_v37 }
  0x4d   :  { %886 = vmatpush.bf16.msra.mxu1 %v2298_v38  ;;  %v1962_v38 = vld [vmem:[#allocation2 + $0xf4] sm:$0xf] }
  0x50   :  { %874 = vmatpush.bf16.msra.mxu0 %v2289_v41  ;;  %v1963_v41 = vor.u32 %v2315_v39, %v1962_v38  ;;  %v2331_v39 = vld [vmem:[%s3105_s4 + $0x11c] sm:$0xf] }
  0x51   :  { %887 = vmatpush.bf16.msra.mxu1 %v2297_v42  ;;  %v2305_v42 = vld [vmem:[#allocation2 + $0x58] sm:$0xf0] }
  0x52   :  { %v1987_v43 = vor.u32 %v2305_v42, %v1986_v40  ;;  %v2060_v40 = vld [vmem:[%s3105_s4 + $0x134] sm:$0xf0] }
  0x54   :  { %875 = vmatpush.bf16.msra.mxu0 %v2288_v45  ;;  %v2314_v45 = vld [vmem:[#allocation2 + $0xe8] sm:$0xf0] }
  0x55   :  { %888 = vmatpush.bf16.msra.mxu1 %v2296_v46  ;;  %v1982_v46 = vld [vmem:[#allocation2 + $0x44] sm:$0xf]  ;;  %v1959_v47 = vor.u32 %v2314_v45, %v1958_v44  ;;  %v2339_v45 = vld [vmem:[%s3105_s4 + $0x1a8] sm:$0xf0] }
  0xa4   :  { %v137_v52 = vpop.f32.mrf.mxu0 }
  0xa5   :  { %v198_v54 = vpop.f32.mrf.mxu1 }
  0xa6   :  { %v199_v55 = vadd.f32 %v198_v54, %v137_v52  ;;  %v2287_v52 = vld [vmem:[%s3103_s2 + $0x198] sm:$0xff]  ;;  %v2270_v54 = vld [vmem:[%s3103_s2 + $0x110] sm:$0xff] }
  0xa7   :  { %876 = vmatpush.bf16.msra.mxu0 %v2287_v52  ;;  %851 = vmatpush.bf16.msrb.mxu2 %v2270_v54  ;;  %v1954_v52 = vld [vmem:[#allocation2 + $0xd4] sm:$0xf] }
  0xa8   :  { %v205_v56 = vadd.f32 %v2375_v53, %v199_v55  ;;  %v2295_v53 = vld [vmem:[%s3103_s2 + $0x1d8] sm:$0xff]  ;;  %v2278_v55 = vld [vmem:[%s3103_s2 + $0x150] sm:$0xff] }
  0xa9   :  { %889 = vmatpush.bf16.msra.mxu1 %v2295_v53  ;;  %864 = vmatpush.bf16.msrb.mxu3 %v2278_v55  ;;  %v2313_v53 = vld [vmem:[#allocation2 + $0xd8] sm:$0xf0]  ;;  %v1978_v54 = vld [vmem:[#allocation2 + $0x34] sm:$0xf] }
  0xaa   :  { %206 = vmax.xlane.f32.xlu0 %v205_v56  ;;  %v1955_v55 = vor.u32 %v2313_v53, %v1954_v52  ;;  %v2063_v52 = vor.u32 %v2331_v39, %v2060_v40  ;;  %v2046_v53 = vld [vmem:[%s3105_s4 + $0xe0] sm:$0xf] }
  0xab   :  { %852 = vmatpush.bf16.msrb.mxu2 %v2269_v59  ;;  %v2312_v59 = vld [vmem:[#allocation2 + $0xc8] sm:$0xf0] }
  0xac   :  { %v139_v57 = vpop.f32.mrf.mxu0 }
  0xad   :  { %v200_v58 = vpop.f32.mrf.mxu1  ;;  %v2294_v57 = vld [vmem:[%s3103_s2 + $0x1d0] sm:$0xff]  ;;  %865 = vmatpush.bf16.msrb.mxu3 %v2277_v60  ;;  %v1974_v60 = vld [vmem:[#allocation2 + $0x24] sm:$0xf] }
  0xae   :  { %v238_v58 = vshrl.u32 %v228_v49, 7  ;;  %890 = vmatpush.bf16.msra.mxu1 %v2294_v57  ;;  %v1983_v49 = vor.u32 %v2304_v48, %v1982_v46  ;;  %v2154_v46 = vld [vmem:[%s3105_s4 + $0x124] sm:$0xf] }
  0xaf   :  { %853 = vmatpush.bf16.msrb.mxu2 %v2268_v1  ;;  %v2311_v1 = vld [vmem:[#allocation2 + $0xb8] sm:$0xf0] }
  0xb0   :  { %v248_v63 = vadd.s32 1, %v238_v58  ;;  %v2670_v6 = vmul.u32 128, %v238_v58  ;;  %v1950_v58 = vld [vmem:[#allocation2 + $0xc4] sm:$0xf] }
  0xb1   :  { %866 = vmatpush.bf16.msrb.mxu3 %v2276_v2  ;;  %v1970_v2 = vld [vmem:[#allocation2 + $0x14] sm:$0xf] }
  0xb2   :  { %891 = vmatpush.bf16.msra.mxu1 %v2293_v62  ;;  %v2672_v7 = vmul.u32 128, %v248_v63  ;;  %vm240_vm0 = vcmp.ge.s32.totalorder %v229_v5, %v2670_v6  ;;  %vm241_vm3 = vcmp.ge.s32.totalorder %v230_v9, %v2670_v6  ;;  %vm242_vm7 = vcmp.ge.s32.totalorder %v231_v11, %v2670_v6  ;;  %v2302_v62 = vld [vmem:[#allocation2 + $0x28] sm:$0xf0] }
  0xb3   :  { %vm243_vm11 = vcmp.ge.s32.totalorder %v232_v14, %v2670_v6  ;;  %v1975_v63 = vor.u32 %v2302_v62, %v1974_v60 }
  0xb4   :  { %vm250_vm1 = vcmp.lt.s32.totalorder %v229_v5, %v2672_v7  ;;  %vm251_vm4 = vcmp.lt.s32.totalorder %v230_v9, %v2672_v7  ;;  %vm252_vm8 = vcmp.lt.s32.totalorder %v231_v11, %v2672_v7  ;;  %vm253_vm12 = vcmp.lt.s32.totalorder %v232_v14, %v2672_v7 }
  0xb5   :  { %vm2676_vm2 = vmand %vm240_vm0, %vm250_vm1 }
  0xb6   :  { %892 = vmatpush.bf16.msra.mxu1 %v2292_v4  ;;  %vm1908_vm6 = vmpackc.low %vm2676_vm2, %vm2676_vm2  ;;  %vm255_vm2 = vcmp.lt.s32.totalorder %v234_v33, %v2672_v7  ;;  %v2301_v4 = vld [vmem:[#allocation2 + $0x18] sm:$0xf0] }
  0xb7   :  { %vm2687_vm10 = vmand %vm241_vm3, %vm251_vm4  ;;  %v1971_v5 = vor.u32 %v2301_v4, %v1970_v2  ;;  %v2326_v4 = vld [vmem:[%s3105_s4 + $0xc0] sm:$0xf0] }
  0xb8   :  { %vm2693_vm15 = vmand %vm242_vm7, %vm252_vm8  ;;  %vm254_vm7 = vcmp.lt.s32.totalorder %v233_v30, %v2672_v7 }
  0xb9   :  { %vm2697_vm0 = vmand %vm243_vm11, %vm253_vm12  ;;  %vm247_vm12 = vcmp.ge.s32.totalorder %v236_v36, %v2670_v6 }
  0xba   :  { %vm1911_vm1 = vmpackc.low %vm2687_vm10, %vm2687_vm10  ;;  %vm256_vm10 = vcmp.lt.s32.totalorder %v235_v35, %v2672_v7 }
  0xbb   :  { %vm1914_vm3 = vmpackc.low %vm2693_vm15, %vm2693_vm15 }
  0xbc   :  { %vm1917_vm4 = vmpackc.low %vm2697_vm0, %vm2697_vm0 }
 0x11d   :  { %v207_v19 = vpop.xlane.xlu0 %206 }
 0x11e   :  { %v208_v20 = vsub.f32 %v205_v56, %v207_v19  ;;  %v2286_v56 = vld [vmem:[%s3103_s2 + $0x190] sm:$0xff] }
 0x11f   :  { %877 = vmatpush.bf16.msra.mxu0 %v2286_v56  ;;  %v2303_v56 = vld [vmem:[#allocation2 + $0x38] sm:$0xf0] }
 0x120   :  { %v209_v21 = vmul.f32 1.442695, %v208_v20  ;;  %v1979_v57 = vor.u32 %v2303_v56, %v1978_v54  ;;  %v2329_v54 = vld [vmem:[%s3105_s4 + $0xf8] sm:$0xf0] }
 0x121   :  { %v2047_v62 = vor.u32 %v2329_v54, %v2046_v53  ;;  %v2317_v53 = vld [vmem:[%s3105_s4 + $0x18] sm:$0xf0]  ;;  %v2316_v54 = vld [vmem:[%s3105_s4 + $0x4] sm:$0xf] }
 0x122   :  { %2378 = vpow2.f32 %v209_v21 }
 0x123   :  { %878 = vmatpush.bf16.msra.mxu0 %v2285_v61  ;;  %v1951_v61 = vor.u32 %v2312_v59, %v1950_v58  ;;  %v2078_v58 = vld [vmem:[%s3105_s4 + $0x158] sm:$0xf]  ;;  %v2336_v59 = vld [vmem:[%s3105_s4 + $0x170] sm:$0xf0] }
 0x127   :  { %879 = vmatpush.bf16.msra.mxu0 %v2284_v3 }
 0x128   :  { %v2547_v22 = vpop.eup %2378 }
 0x129   :  { %211 = vadd.xlane.f32.xlu0 %v2547_v22 }
 0x19c   :  { %v212_v0 = vpop.xlane.xlu0 %211 }
 0x19d   :  { %2380 = vrcp.f32 %v212_v0  ;;  %v224_v15 = vand.u32 2147483648, %v212_v0  ;;  %v222_v17 = vand.u32 2147483647, %v212_v0  ;;  %vm218_vm9 = vweird.f32 %v212_v0 }
 0x19f   :  { %v225_v20 = vor.u32 1.1754944e-38, %v224_v15  ;;  %vm223_vm14 = vcmp.eq.f32.partialorder %v222_v17, 8.507059e+37  ;;  %v1934_v15 = vld [vmem:[#allocation2 + $0x84] sm:$0xf] }
 0x1a3   :  { %v2381_v8 = vpop.eup %2380 }
 0x1a4   :  { %v214_v10 = vmul.f32 %v2381_v8, %v212_v0  ;;  %vm219_vm5 = vweird.f32 %v2381_v8  ;;  %v1946_v0 = vld [vmem:[#allocation2 + $0xb4] sm:$0xf] }
 0x1a5   :  { %vm220_vm13 = vmor %vm218_vm9, %vm219_vm5  ;;  %vm244_vm5 = vcmp.ge.s32.totalorder %v233_v30, %v2670_v6  ;;  %vm245_vm9 = vcmp.ge.s32.totalorder %v234_v33, %v2670_v6  ;;  %v1947_v3 = vor.u32 %v2311_v1, %v1946_v0  ;;  %v2178_v30 = vld [vmem:[%s3105_s4 + $0x194] sm:$0xf]  ;;  %v2142_v0 = vld [vmem:[%s3105_s4 + $0xec] sm:$0xf] }
 0x1a6   :  { %v215_v12 = vsub.f32 1.0, %v214_v10  ;;  %vm2721_vm8 = vmand %vm244_vm5, %vm254_vm7  ;;  %v2300_v10 = vld [vmem:[#allocation2 + $0x8] sm:$0xf0]  ;;  %v2353_v1 = vld [vmem:[%s3105_s4 + $0x104] sm:$0xf0] }
 0x1a7   :  { %vm1920_vm11 = vmpackc.low %vm2721_vm8, %vm2721_vm8 }
 0x1a8   :  { %v216_v16 = vmul.f32 %v2381_v8, %v215_v12  ;;  %v1938_v12 = vld [vmem:[#allocation2 + $0x94] sm:$0xf] }
 0x1a9   :  { %v1939_v14 = vor.u32 %v2309_v13, %v1938_v12  ;;  %v2130_v13 = vld [vmem:[%s3105_s4 + $0xb4] sm:$0xf] }
 0x1aa   :  { %v217_v18 = vadd.f32 %v2381_v8, %v216_v16  ;;  %v2308_v16 = vld [vmem:[#allocation2 + $0x88] sm:$0xf0] }
 0x1ab   :  { %v1935_v17 = vor.u32 %v2308_v16, %v1934_v15  ;;  %v2350_v15 = vld [vmem:[%s3105_s4 + $0xcc] sm:$0xf0]  ;;  %v2054_v16 = vld [vmem:[%s3105_s4 + $0xe8] sm:$0xf] }
 0x1ac   :  { %v221_v21 = vsel %vm220_vm13, %v2381_v8, %v217_v18  ;;  %vm257_vm13 = vcmp.lt.s32.totalorder %v236_v36, %v2672_v7  ;;  %v2310_v7 = vld [vmem:[#allocation2 + $0xa8] sm:$0xf0]  ;;  %v1966_v8 = vld [vmem:[#allocation2 + $0x4] sm:$0xf]  ;;  %v2166_v36 = vld [vmem:[%s3105_s4 + $0x15c] sm:$0xf] }
 0x1ad   :  { %v226_v24 = vsel %vm223_vm14, %v225_v20, %v221_v21  ;;  %vm263_vm14 = vmand %vm245_vm9, %vm255_vm2  ;;  %v1967_v11 = vor.u32 %v2300_v10, %v1966_v8  ;;  %v2082_v20 = vld [vmem:[%s3105_s4 + $0x188] sm:$0xf]  ;;  %v2338_v21 = vld [vmem:[%s3105_s4 + $0x1a0] sm:$0xf0] }
 0x1ae   :  { %v227_v28 = vmul.f32 %v2547_v22, %v226_v24  ;;  %v1990_v22 = vld [vmem:[#allocation2 + $0x64] sm:$0xf]  ;;  %vm265_vm0 = vmand %vm247_vm12, %vm257_vm13  ;;  %v2083_v23 = vor.u32 %v2338_v21, %v2082_v20  ;;  %v2084_v24 = vld [vmem:[%s3105_s4 + $0x1a4] sm:$0xf0] }
 0x1af   :  { %v1991_v34 = vor.u32 %v2306_v32, %v1990_v22  ;;  %v2362_v22 = vld [vmem:[%s3105_s4 + $0x1ac] sm:$0xf0]  ;;  %v2036_v10 = vld [vmem:[%s3105_s4 + $0xc4] sm:$0xf0] }
 0x1b0   :  { %v1909_v29 = vpack.c.bf16 %v227_v28, %v227_v28  ;;  %1582 = vst [vmem:[%s3107_s6 + $0x10] sm:$0xff] %v227_v28  ;;  %v2334_v28 = vld [vmem:[%s3105_s4 + $0x154] sm:$0xf]  ;;  %v2179_v33 = vor.u32 %v2362_v22, %v2178_v30  ;;  %v2118_v30 = vld [vmem:[%s3105_s4 + $0x7c] sm:$0xf] }
 0x1b2   :  { %1910 = vmatmul.msk.bf16.vlgmr.msra.gmra.mxu2 %vm1908_vm6, %v1909_v29  ;;  %1913 = vmatmul.msk.bf16.vlgmr.msra.gmra.mxu3 %vm1911_vm1, %v1909_v29  ;;  %vm246_vm6 = vcmp.ge.s32.totalorder %v235_v35, %v2670_v6  ;;  %vm1923_vm1 = vmpackc.low %vm263_vm14, %vm263_vm14  ;;  %v1942_v6 = vld [vmem:[#allocation2 + $0xa4] sm:$0xf]  ;;  %v2332_v35 = vld [vmem:[%s3105_s4 + $0x130] sm:$0xf0] }
 0x1b3   :  { %1916 = vmatmul.msk.bf16.vlgmr.msrb.gmra.mxu0 %vm1914_vm3, %v1909_v29  ;;  %1919 = vmatmul.msk.bf16.vlgmr.msrb.gmra.mxu1 %vm1917_vm4, %v1909_v29  ;;  %vm264_vm15 = vmand %vm246_vm6, %vm256_vm10  ;;  %v1943_v9 = vor.u32 %v2310_v7, %v1942_v6  ;;  %v2333_v6 = vld [vmem:[%s3105_s4 + $0x138] sm:$0xf0] }
 0x1b4   :  { %1040 = vmatpush.bf16.msra.mxu3 %v1995_v31  ;;  %vm1926_vm3 = vmpackc.low %vm264_vm15, %vm264_vm15  ;;  %979 = vmatpush.bf16.msra.mxu2 %v1963_v41  ;;  %v2071_v31 = vor.u32 %v2335_v26, %v2070_v25  ;;  %v2359_v41 = vld [vmem:[%s3105_s4 + $0x174] sm:$0xf0]  ;;  %v2323_v25 = vld [vmem:[%s3105_s4 + $0x88] sm:$0xf0] }
 0x1b5   :  { %vm1929_vm4 = vmpackc.low %vm265_vm0, %vm265_vm0  ;;  %1226 = vmatpush.bf16.msrb.mxu0 %v2083_v23  ;;  %v2167_v42 = vor.u32 %v2359_v41, %v2166_v36  ;;  %v2322_v26 = vld [vmem:[%s3105_s4 + $0x74] sm:$0xf] }
 0x1b8   :  { %1041 = vmatpush.bf16.msra.mxu3 %v1991_v34  ;;  %980 = vmatpush.bf16.msra.mxu2 %v1959_v47  ;;  %v2058_v34 = vld [vmem:[%s3105_s4 + $0x118] sm:$0xf]  ;;  %v2356_v47 = vld [vmem:[%s3105_s4 + $0x13c] sm:$0xf0] }
 0x1b9   :  { %1227 = vmatpush.bf16.msrb.mxu0 %v2071_v31  ;;  %v2059_v44 = vor.u32 %v2332_v35, %v2058_v34  ;;  %v2155_v60 = vor.u32 %v2356_v47, %v2154_v46  ;;  %v2347_v31 = vld [vmem:[%s3105_s4 + $0x94] sm:$0xf0]  ;;  %v2320_v34 = vld [vmem:[%s3105_s4 + $0x50] sm:$0xf0] }
 0x1ba   :  { %v2119_v39 = vor.u32 %v2347_v31, %v2118_v30  ;;  %v2006_v30 = vld [vmem:[%s3105_s4 + $0x8] sm:$0xf]  ;;  %v2318_v31 = vld [vmem:[%s3105_s4 + $0x20] sm:$0xf0] }
 0x1bc   :  { %1042 = vmatpush.bf16.msra.mxu3 %v1987_v43  ;;  %981 = vmatpush.bf16.msra.mxu2 %v1955_v55  ;;  %v2090_v43 = vld [vmem:[%s3105_s4 + $0x190] sm:$0xf]  ;;  %v2328_v55 = vld [vmem:[%s3105_s4 + $0xe4] sm:$0xf] }
 0x1bd   :  { %v2091_v56 = vor.u32 %v2339_v45, %v2090_v43  ;;  %1228 = vmatpush.bf16.msrb.mxu0 %v2059_v44 }
 0x1c0   :  { %1043 = vmatpush.bf16.msra.mxu3 %v1983_v49  ;;  %982 = vmatpush.bf16.msra.mxu2 %v1951_v61  ;;  %v2079_v61 = vor.u32 %v2336_v59, %v2078_v58  ;;  %v2327_v58 = vld [vmem:[%s3105_s4 + $0xc8] sm:$0xf0] }
 0x1c1   :  { %1229 = vmatpush.bf16.msrb.mxu0 %v2047_v62  ;;  %v2180_v62 = vld [vmem:[%s3105_s4 + $0x1b0] sm:$0xf0] }
 0x1c2   :  { %1922 = vmatmul.msk.bf16.vlgmr.msrb.gmra.mxu2 %vm1920_vm11, %v1909_v29  ;;  %1925 = vmatmul.msk.bf16.vlgmr.msrb.gmra.mxu3 %vm1923_vm1, %v1909_v29 }
 0x1c3   :  { %1928 = vmatmul.msk.bf16.vlgmr.msra.gmra.mxu0 %vm1926_vm3, %v1909_v29  ;;  %1931 = vmatmul.msk.bf16.vlgmr.msra.gmra.mxu1 %vm1929_vm4, %v1909_v29  ;;  %v2072_v29 = vld [vmem:[%s3105_s4 + $0x16c] sm:$0xf0] }
 0x1c4   :  { %1044 = vmatpush.bf16.msra.mxu3 %v1979_v57  ;;  %983 = vmatpush.bf16.msra.mxu2 %v1947_v3  ;;  %v2075_v32 = vor.u32 %v2334_v28, %v2072_v29  ;;  %v2048_v57 = vld [vmem:[%s3105_s4 + $0xfc] sm:$0xf0] }
 0x1c5   :  { %v2051_v3 = vor.u32 %v2328_v55, %v2048_v57  ;;  %v2042_v57 = vld [vmem:[%s3105_s4 + $0xb0] sm:$0xf] }
 0x1c8   :  { %1045 = vmatpush.bf16.msra.mxu3 %v1975_v63  ;;  %984 = vmatpush.bf16.msra.mxu2 %v1943_v9  ;;  %v2034_v63 = vld [vmem:[%s3105_s4 + $0xa8] sm:$0xf]  ;;  %v2325_v9 = vld [vmem:[%s3105_s4 + $0xac] sm:$0xf] }
 0x1c9   :  { %v2039_v23 = vor.u32 %v2325_v9, %v2036_v10  ;;  %v2168_v10 = vld [vmem:[%s3105_s4 + $0x178] sm:$0xf0] }
 0x1cc   :  { %1046 = vmatpush.bf16.msra.mxu3 %v1971_v5  ;;  %985 = vmatpush.bf16.msra.mxu2 %v1939_v14  ;;  %v2066_v5 = vld [vmem:[%s3105_s4 + $0x120] sm:$0xf]  ;;  %v2035_v14 = vor.u32 %v2326_v4, %v2034_v63  ;;  %v2186_v63 = vld [vmem:[%s3105_s4 + $0x19c] sm:$0xf] }
 0x1cd   :  { %v2067_v12 = vor.u32 %v2333_v6, %v2066_v5  ;;  %v2030_v6 = vld [vmem:[%s3105_s4 + $0x78] sm:$0xf] }
 0x1ce   :  { %1230 = vmatpush.bf16.msrb.mxu0 %v2035_v14 }
 0x1d0   :  { %1047 = vmatpush.bf16.msra.mxu3 %v1967_v11  ;;  %986 = vmatpush.bf16.msra.mxu2 %v1935_v17  ;;  %v2143_v11 = vor.u32 %v2353_v1, %v2142_v0  ;;  %v2330_v17 = vld [vmem:[%s3105_s4 + $0x100] sm:$0xf0]  ;;  %v2363_v1 = vld [vmem:[%s3105_s4 + $0x1b4] sm:$0xf0] }
 0x1d1   :  { %v2055_v28 = vor.u32 %v2330_v17, %v2054_v16  ;;  %v2187_v4 = vor.u32 %v2363_v1, %v2186_v63  ;;  %v2341_v16 = vld [vmem:[%s3105_s4 + $0x24] sm:$0xf0]  ;;  %v2376_v63 = vld [vmem:[%s3106_s5 + $0x1] ss:$0 sm:$0xff] }
 0x1d3   :  { %1048 = vmatmul.bf16.vlgmr.msra.gmra.mxu3 %v2468_v51  ;;  %v2337_v51 = vld [vmem:[%s3105_s4 + $0x18c] sm:$0xf] }
 0x1d4   :  { %v2087_v27 = vor.u32 %v2337_v51, %v2084_v24  ;;  %1432 = vmatpush.bf16.msrb.mxu3 %v2179_v33  ;;  %1252 = vmatpush.bf16.msrb.mxu2 %v2091_v56  ;;  %v2022_v24 = vld [vmem:[%s3105_s4 + $0x70] sm:$0xf]  ;;  %v2010_v33 = vld [vmem:[%s3105_s4 + $0x38] sm:$0xf]  ;;  %v2000_v56 = vld [vmem:[%s3105_s4 + $0x1c] sm:$0xf0] }
 0x1d5   :  { %v2023_v29 = vor.u32 %v2323_v25, %v2022_v24  ;;  %v2011_v40 = vor.u32 %v2320_v34, %v2010_v33  ;;  %v2003_v59 = vor.u32 %v2316_v54, %v2000_v56  ;;  %v2156_v25 = vld [vmem:[%s3105_s4 + $0x140] sm:$0xf0]  ;;  %v2144_v33 = vld [vmem:[%s3105_s4 + $0x108] sm:$0xf0]  ;;  %v2150_v34 = vld [vmem:[%s3105_s4 + $0xf4] sm:$0xf] }
 0x1d6   :  { %1239 = vmatpush.bf16.msrb.mxu1 %v2087_v27  ;;  %v2131_v27 = vor.u32 %v2350_v15, %v2130_v13  ;;  %v2094_v15 = vld [vmem:[%s3105_s4 + $0xc] sm:$0xf]  ;;  %v2345_v54 = vld [vmem:[%s3105_s4 + $0x64] sm:$0xf0] }
 0x1d7   :  { %1231 = vmatpush.bf16.msrb.mxu0 %v2023_v29  ;;  %v2095_v17 = vor.u32 %v2341_v16, %v2094_v15  ;;  %v2206_v16 = vld [vmem:[%s3105_s4 + $0xf8] sm:$0xf] }
 0x1d8   :  { %1433 = vmatpush.bf16.msrb.mxu3 %v2167_v42  ;;  %1253 = vmatpush.bf16.msrb.mxu2 %v2079_v61  ;;  %v2361_v61 = vld [vmem:[%s3105_s4 + $0x198] sm:$0xf] }
 0x1d9   :  { %v2183_v0 = vor.u32 %v2361_v61, %v2180_v62 }
 0x1da   :  { %1240 = vmatpush.bf16.msrb.mxu1 %v2075_v32 }
 0x1db   :  { %1232 = vmatpush.bf16.msrb.mxu0 %v2011_v40 }
 0x1dc   :  { %1434 = vmatpush.bf16.msrb.mxu3 %v2155_v60  ;;  %1254 = vmatpush.bf16.msrb.mxu2 %v2067_v12  ;;  %v2043_v60 = vor.u32 %v2327_v58, %v2042_v57  ;;  %v2360_v12 = vld [vmem:[%s3105_s4 + $0x17c] sm:$0xf0]  ;;  %v2340_v57 = vld [vmem:[%s3105_s4 + $0x10] sm:$0xf]  ;;  %v2096_v58 = vld [vmem:[%s3105_s4 + $0x28] sm:$0xf0] }
 0x1dd   :  { %v2099_v61 = vor.u32 %v2340_v57, %v2096_v58 }
 0x1de   :  { %1241 = vmatpush.bf16.msrb.mxu1 %v2063_v52  ;;  %v1998_v52 = vld [vmem:[%s3105_s4] sm:$0xf] }
 0x1df   :  { %v1999_v55 = vor.u32 %v2317_v53, %v1998_v52  ;;  %v2108_v52 = vld [vmem:[%s3105_s4 + $0x60] sm:$0xf0]  ;;  %v2114_v53 = vld [vmem:[%s3105_s4 + $0x4c] sm:$0xf] }
 0x1e0   :  { %1435 = vmatpush.bf16.msrb.mxu3 %v2143_v11  ;;  %1255 = vmatpush.bf16.msrb.mxu2 %v2055_v28  ;;  %v2174_v11 = vld [vmem:[%s3105_s4 + $0x164] sm:$0xf]  ;;  %v2357_v28 = vld [vmem:[%s3105_s4 + $0x144] sm:$0xf0]  ;;  %v2115_v56 = vor.u32 %v2345_v54, %v2114_v53 }
 0x1e1   :  { %1233 = vmatpush.bf16.msrb.mxu0 %v1999_v55  ;;  %v2175_v14 = vor.u32 %v2360_v12, %v2174_v11  ;;  %v2214_v11 = vld [vmem:[%s3105_s4 + $0x168] sm:$0xf] }
 0x1e2   :  { %1242 = vmatpush.bf16.msrb.mxu1 %v2051_v3  ;;  %v2344_v3 = vld [vmem:[%s3105_s4 + $0x5c] sm:$0xf0] }
 0x1e4   :  { %1436 = vmatpush.bf16.msrb.mxu3 %v2131_v27  ;;  %1256 = vmatpush.bf16.msrb.mxu2 %v2043_v60  ;;  %v2342_v60 = vld [vmem:[%s3105_s4 + $0x2c] sm:$0xf0] }
 0x1e5   :  { %1445 = vmatpush.bf16.msra.mxu0 %v2183_v0 }
 0x1e6   :  { %1243 = vmatpush.bf16.msrb.mxu1 %v2039_v23  ;;  %v2355_v23 = vld [vmem:[%s3105_s4 + $0x128] sm:$0xf] }
 0x1e7   :  { %v2159_v27 = vor.u32 %v2355_v23, %v2156_v25  ;;  %v2367_v23 = vld [vmem:[%s3105_s4 + $0xd8] sm:$0xf0] }
 0x1e8   :  { %1437 = vmatpush.bf16.msrb.mxu3 %v2119_v39  ;;  %v2138_v39 = vld [vmem:[%s3105_s4 + $0xbc] sm:$0xf] }
 0x230   :  { %v2735_v18 = vpop.f32.mrf.mxu0  ;;  %v2737_v19 = vpop.f32.mrf.mxu1 }
 0x235   :  { %v803_v37 = vpop.f32.mrf.mxu2  ;;  %v816_v38 = vpop.f32.mrf.mxu3 }
 0x236   :  { %v817_v2 = vadd.f32 %v816_v38, %v803_v37  ;;  %v2319_v37 = vld [vmem:[%s3105_s4 + $0x3c] sm:$0xf] }
 0x238   :  { %v831_v48 = vpop.f32.mrf.mxu0  ;;  %v844_v49 = vpop.f32.mrf.mxu1  ;;  %v830_v20 = vadd.f32 %v2735_v18, %v817_v2  ;;  %v2024_v18 = vld [vmem:[%s3105_s4 + $0x8c] sm:$0xf0]  ;;  %v2106_v2 = vld [vmem:[%s3105_s4 + $0x44] sm:$0xf] }
 0x239   :  { %v2027_v32 = vor.u32 %v2322_v26, %v2024_v18  ;;  %v2107_v5 = vor.u32 %v2344_v3, %v2106_v2  ;;  %v2162_v26 = vld [vmem:[%s3105_s4 + $0x12c] sm:$0xf] }
 0x23a   :  { %v843_v22 = vadd.f32 %v2737_v19, %v830_v20  ;;  %v2012_v19 = vld [vmem:[%s3105_s4 + $0x54] sm:$0xf0]  ;;  %v2163_v29 = vor.u32 %v2357_v28, %v2162_v26  ;;  %v2366_v28 = vld [vmem:[%s3105_s4 + $0xa0] sm:$0xf0] }
 0x23b   :  { %1244 = vmatpush.bf16.msrb.mxu1 %v2027_v32  ;;  %v2015_v44 = vor.u32 %v2319_v37, %v2012_v19  ;;  %1438 = vmatpush.bf16.msrb.mxu3 %v2107_v5  ;;  %v2007_v32 = vor.u32 %v2318_v31, %v2006_v30  ;;  %v2349_v19 = vld [vmem:[%s3105_s4 + $0xb8] sm:$0xf] }
 0x23d   :  { %v805_v7 = vpop.f32.mrf.mxu2  ;;  %v818_v8 = vpop.f32.mrf.mxu3 }
 0x23e   :  { %v2324_v7 = vld [vmem:[%s3105_s4 + $0x90] sm:$0xf0]  ;;  %v2358_v8 = vld [vmem:[%s3105_s4 + $0x160] sm:$0xf] }
 0x23f   :  { %1245 = vmatpush.bf16.msrb.mxu1 %v2015_v44  ;;  %v2031_v9 = vor.u32 %v2324_v7, %v2030_v6  ;;  %v2171_v13 = vor.u32 %v2358_v8, %v2168_v10  ;;  %1439 = vmatpush.bf16.msrb.mxu3 %v2095_v17  ;;  %v2120_v44 = vld [vmem:[%s3105_s4 + $0x98] sm:$0xf0]  ;;  %v2218_v8 = vld [vmem:[%s3105_s4 + $0x1a0] sm:$0xf]  ;;  %v2368_v17 = vld [vmem:[%s3105_s4 + $0x110] sm:$0xf0] }
 0x240   :  { %v881_v21 = vpop.f32.mrf.mxu0  ;;  %v894_v51 = vpop.f32.mrf.mxu1 }
 0x241   :  { %1257 = vmatpush.bf16.msrb.mxu2 %v2031_v9  ;;  %1446 = vmatpush.bf16.msra.mxu0 %v2171_v13  ;;  %v2371_v9 = vld [vmem:[%s3105_s4 + $0x1b8] sm:$0xf0]  ;;  %v2210_v13 = vld [vmem:[%s3105_s4 + $0x130] sm:$0xf] }
 0x242   :  { %1440 = vmatmul.bf16.vlgmr.msrb.gmra.mxu3 %v2466_v50  ;;  %v2219_v10 = vor.u32 %v2371_v9, %v2218_v8 }
 0x243   :  { %1246 = vmatpush.bf16.msrb.mxu1 %v2003_v59  ;;  %v2102_v59 = vld [vmem:[%s3105_s4 + $0x14] sm:$0xf] }
 0x244   :  { %v2103_v62 = vor.u32 %v2342_v60, %v2102_v59 }
 0x245   :  { %v855_v35 = vpop.f32.mrf.mxu2  ;;  %v868_v36 = vpop.f32.mrf.mxu3  ;;  %1447 = vmatpush.bf16.msra.mxu0 %v2159_v27  ;;  %v2198_v27 = vld [vmem:[%s3105_s4 + $0x88] sm:$0xf] }
 0x246   :  { %v856_v38 = vadd.f32 %v855_v35, %v843_v22  ;;  %v2352_v22 = vld [vmem:[%s3105_s4 + $0xf0] sm:$0xf] }
 0x247   :  { %1458 = vmatpush.bf16.msra.mxu1 %v2187_v4  ;;  %v2354_v35 = vld [vmem:[%s3105_s4 + $0x10c] sm:$0xf0] }
 0x248   :  { %v869_v41 = vadd.f32 %v868_v36, %v856_v38  ;;  %v883_v42 = vpop.f32.mrf.mxu0  ;;  %v896_v43 = vpop.f32.mrf.mxu1  ;;  %v2147_v36 = vor.u32 %v2352_v22, %v2144_v33  ;;  %v2151_v37 = vor.u32 %v2354_v35, %v2150_v34  ;;  %v2132_v38 = vld [vmem:[%s3105_s4 + $0xd0] sm:$0xf0]  ;;  %v2194_v33 = vld [vmem:[%s3105_s4 + $0x50] sm:$0xf]  ;;  %v2365_v34 = vld [vmem:[%s3105_s4 + $0x68] sm:$0xf0] }
 0x249   :  { %v2135_v40 = vor.u32 %v2349_v19, %v2132_v38  ;;  %v2346_v43 = vld [vmem:[%s3105_s4 + $0x80] sm:$0xf]  ;;  %v2195_v35 = vor.u32 %v2365_v34, %v2194_v33 }
 0x24a   :  { %v882_v45 = vadd.f32 %v881_v21, %v869_v41  ;;  %v2018_v21 = vld [vmem:[%s3105_s4 + $0x40] sm:$0xf]  ;;  %1448 = vmatpush.bf16.msra.mxu0 %v2147_v36  ;;  %v2351_v41 = vld [vmem:[%s3105_s4 + $0xd4] sm:$0xf0] }
 0x24b   :  { %1459 = vmatpush.bf16.msra.mxu1 %v2175_v14  ;;  %v2139_v42 = vor.u32 %v2351_v41, %v2138_v39  ;;  %v2369_v14 = vld [vmem:[%s3105_s4 + $0x148] sm:$0xf0]  ;;  %v2190_v36 = vld [vmem:[%s3105_s4 + $0x18] sm:$0xf] }
 0x24c   :  { %v895_v46 = vadd.f32 %v894_v51, %v882_v45  ;;  %v2321_v51 = vld [vmem:[%s3105_s4 + $0x58] sm:$0xf0]  ;;  %v2126_v45 = vld [vmem:[%s3105_s4 + $0x84] sm:$0xf]  ;;  %v2211_v15 = vor.u32 %v2369_v14, %v2210_v13 }
 0x24d   :  { %v857_v47 = vpop.f32.mrf.mxu2  ;;  %v870_v48 = vpop.f32.mrf.mxu3  ;;  %v2019_v24 = vor.u32 %v2321_v51, %v2018_v21  ;;  %v46_v21 = vld [vmem:[%s3106_s5 + $0x5] sm:$0x7]  ;;  %v2202_v51 = vld [vmem:[%s3105_s4 + $0xc0] sm:$0xf] }
 0x24e   :  { %v914_v49 = vpack.c.bf16 %v895_v46, %v895_v46  ;;  %v2348_v46 = vld [vmem:[%s3105_s4 + $0x9c] sm:$0xf0]  ;;  %1449 = vmatpush.bf16.msra.mxu0 %v2135_v40  ;;  %v2123_v47 = vor.u32 %v2346_v43, %v2120_v44  ;;  %v2203_v25 = vor.u32 %v2367_v23, %v2202_v51  ;;  %v1298_v26 = vperm.slane %v46_v21, 0 }
 0x24f   :  { %1258 = vmatpush.bf16.msrb.mxu2 %v2019_v24  ;;  %1460 = vmatpush.bf16.msra.mxu1 %v2163_v29  ;;  %v2127_v48 = vor.u32 %v2348_v46, %v2126_v45  ;;  %v45_v24 = vld [vmem:[%s3106_s5 + $0x2] sm:$0x7]  ;;  %v2199_v29 = vor.u32 %v2366_v28, %v2198_v27  ;;  %v1299_v45 = vperm.slane %v46_v21, 1  ;;  %v1300_v46 = vperm.slane %v46_v21, 2 }
 0x250   :  { %987 = vmatmul.bf16.vlgmr.msra.gmra.mxu2 %v914_v49  ;;  %v2343_v49 = vld [vmem:[%s3105_s4 + $0x48] sm:$0xf]  ;;  %v1093_v44 = vperm.slane %v45_v24, 1  ;;  %v1094_v57 = vperm.slane %v45_v24, 2 }
 0x251   :  { %v2111_v55 = vor.u32 %v2343_v49, %v2108_v52 }
 0x252   :  { %1450 = vmatpush.bf16.msra.mxu0 %v2123_v47 }
 0x253   :  { %1259 = vmatpush.bf16.msrb.mxu2 %v2007_v32  ;;  %1461 = vmatpush.bf16.msra.mxu1 %v2151_v37  ;;  %v2364_v37 = vld [vmem:[%s3105_s4 + $0x30] sm:$0xf0] }
 0x254   :  { %v2191_v38 = vor.u32 %v2364_v37, %v2190_v36 }
 0x256   :  { %v1049_v20 = vpop.f32.mrf.mxu3  ;;  %1451 = vmatpush.bf16.msra.mxu0 %v2111_v55 }
 0x257   :  { %1462 = vmatpush.bf16.msra.mxu1 %v2139_v42  ;;  %1556 = vmatpush.bf16.msra.mxu2 %v2219_v10 }
 0x25a   :  { %1452 = vmatpush.bf16.msra.mxu0 %v2099_v61 }
 0x25b   :  { %1463 = vmatpush.bf16.msra.mxu1 %v2127_v48 }
 0x25e   :  { %v1051_v18 = vpop.f32.mrf.mxu3 }
 0x25f   :  { %1464 = vmatpush.bf16.msra.mxu1 %v2115_v56  ;;  %v1092_v18 = vperm.slane %v45_v24, 0 }
 0x263   :  { %1465 = vmatpush.bf16.msra.mxu1 %v2103_v62 }
 0x2c5   :  { %v1441_v6 = vpop.f32.mrf.mxu3 }
 0x2c6   :  { %v1442_v30 = vadd.f32 %v1441_v6, %v1298_v26  ;;  %v2392_v6 = vld [vmem:[%s3102_s1] sm:$0xff] }
 0x2cd   :  { %v1443_v7 = vpop.f32.mrf.mxu3 }
 0x2d3   :  { %v988_v0 = vpop.f32.mrf.mxu2 }
 0x2d4   :  { %v1050_v1 = vadd.f32 %v1049_v20, %v988_v0  ;;  %v2207_v20 = vor.u32 %v2368_v17, %v2206_v16 }
 0x2d6   :  { %v1056_v2 = vadd.f32 %v2376_v63, %v1050_v1 }
 0x2d8   :  { %v1057_v3 = vmax.f32 %v1056_v2, 0.0 }
 0x2da   :  { %v1058_v4 = vpack.c.bf16 %v1057_v3, %v1057_v3 }
 0x2db   :  { %v990_v5 = vpop.f32.mrf.mxu2 }
 0x2dc   :  { %1234 = vmatmul.bf16.vlgmr.msrb.gmra.mxu0 %v1058_v4  ;;  %1247 = vmatmul.bf16.vlgmr.msrb.gmra.mxu1 %v1058_v4 }
 0x2dd   :  { %1260 = vmatmul.bf16.vlgmr.msrb.gmra.mxu2 %v1058_v4 }
 0x2ec   :  { %1453 = vmatmul.bf16.vlgmr.msra.gmra.mxu0 %v2466_v50  ;;  %1466 = vmatmul.bf16.vlgmr.msra.gmra.mxu1 %v2466_v50  ;;  %v2370_v50 = vld [vmem:[%s3105_s4 + $0x180] sm:$0xf0] }
 0x2ed   :  { %v2215_v12 = vor.u32 %v2370_v50, %v2214_v11  ;;  %v2377_v11 = vld [vmem:[%s3106_s5 + $0x8] ss:$0 sm:$0xff] }
 0x2ef   :  { %1557 = vmatpush.bf16.msra.mxu2 %v2215_v12 }
 0x2f3   :  { %1558 = vmatpush.bf16.msra.mxu2 %v2211_v15 }
 0x2f7   :  { %1559 = vmatpush.bf16.msra.mxu2 %v2207_v20 }
 0x2fb   :  { %1560 = vmatpush.bf16.msra.mxu2 %v2203_v25 }
 0x2ff   :  { %1561 = vmatpush.bf16.msra.mxu2 %v2199_v29 }
 0x303   :  { %1562 = vmatpush.bf16.msra.mxu2 %v2195_v35 }
 0x307   :  { %1563 = vmatpush.bf16.msra.mxu2 %v2191_v38 }
 0x359   :  { %v1235_v31 = vpop.f32.mrf.mxu0  ;;  %v1248_v22 = vpop.f32.mrf.mxu1 }
 0x35a   :  { %v1236_v32 = vadd.f32 %v1235_v31, %v1092_v18  ;;  %v1249_v53 = vadd.f32 %v1248_v22, %v1093_v44 }
 0x35c   :  { %v1471_v19 = vadd.f32 %v1442_v30, %v1236_v32 }
 0x35e   :  { %v1472_v39 = vmul.f32 0.5, %v1471_v19 }
 0x360   :  { %2382 = vtanh.f32 %v1472_v39  ;;  %v1261_v40 = vpop.f32.mrf.mxu2 }
 0x361   :  { %v1237_v41 = vpop.f32.mrf.mxu0  ;;  %v1250_v42 = vpop.f32.mrf.mxu1  ;;  %v1262_v61 = vadd.f32 %v1261_v40, %v1094_v57 }
 0x366   :  { %v2383_v43 = vpop.eup %2382 }
 0x367   :  { %v1474_v47 = vmul.f32 0.5, %v2383_v43 }
 0x368   :  { %v1263_v48 = vpop.f32.mrf.mxu2 }
 0x369   :  { %v1454_v49 = vpop.f32.mrf.mxu0  ;;  %v1467_v52 = vpop.f32.mrf.mxu1  ;;  %v1475_v56 = vadd.f32 0.5, %v1474_v47 }
 0x36a   :  { %v1455_v54 = vadd.f32 %v1454_v49, %v1299_v45  ;;  %v1468_v55 = vadd.f32 %v1467_v52, %v1300_v46 }
 0x36c   :  { %v1476_v58 = vadd.f32 %v1455_v54, %v1249_v53  ;;  %v1481_v60 = vmul.f32 %v1475_v56, %v1468_v55 }
 0x36e   :  { %v1477_v59 = vmul.f32 0.5, %v1476_v58  ;;  %v1482_v0 = vadd.f32 %v1481_v60, %v1262_v61 }
 0x370   :  { %2384 = vtanh.f32 %v1477_v59 }
 0x371   :  { %v1456_v62 = vpop.f32.mrf.mxu0  ;;  %v1469_v63 = vpop.f32.mrf.mxu1  ;;  %2386 = vtanh.f32 %v1482_v0 }
 0x376   :  { %v2385_v1 = vpop.eup %2384 }
 0x377   :  { %v1479_v2 = vmul.f32 0.5, %v2385_v1  ;;  %v2387_v5 = vpop.eup %2386 }
 0x379   :  { %v1480_v3 = vadd.f32 0.5, %v1479_v2 }
 0x37b   :  { %v1484_v4 = vsub.f32 1.0, %v1480_v3  ;;  %v1486_v7 = vmul.f32 %v2392_v6, %v1480_v3 }
 0x37d   :  { %v1485_v8 = vmul.f32 %v2387_v5, %v1484_v4 }
 0x37f   :  { %v1487_v9 = vadd.f32 %v1486_v7, %v1485_v8 }
 0x381   :  { %v1488_v10 = vpack.c.bf16 %v1487_v9, %v1487_v9  ;;  %1581 = vst [vmem:[%s3107_s6 + $0x8] sm:$0xff] %v1487_v9 }
 0x383   :  { %1564 = vmatmul.bf16.vlgmr.msra.gmra.mxu2 %v1488_v10 }
 0x406   :  { %v1565_v50 = vpop.f32.mrf.mxu2 }
 0x407   :  { %v1566_v12 = vadd.f32 %v2377_v11, %v1565_v50 }
 0x409   :  { %1569 = vmax.xlane.f32.xlu1 %v1566_v12 }
 0x40e   :  { %v1567_v13 = vpop.f32.mrf.mxu2 }
 0x47c   :  { %v1570_v14 = vpop.xlane.xlu1 %1569 }
 0x47d   :  { %v1571_v15 = vsub.f32 %v1566_v12, %v1570_v14 }
 0x47f   :  { %v1572_v16 = vmul.f32 1.442695, %v1571_v15 }
 0x481   :  { %2388 = vpow2.f32 %v1572_v16 }
 0x487   :  { %v2389_v17 = vpop.eup %2388 }
 0x488   :  { %1574 = vadd.xlane.f32.xlu1 %v2389_v17 }
 0x4fb   :  { %v1575_v20 = vpop.xlane.xlu1 %1574 }
 0x4fc   :  { %2390 = vlog2.f32 %v1575_v20 }
 0x502   :  { %v2391_v21 = vpop.eup %2390 }
 0x503   :  { %v1577_v51 = vmul.f32 0.6931472, %v2391_v21 }
 0x505   :  { %v1578_v23 = vadd.f32 %v1577_v51, %v1570_v14 }
 0x507   :  { %v1579_v24 = vsub.f32 %v1566_v12, %v1578_v23 }
 0x509   :  { %1580 = vst [vmem:[%s3107_s6] sm:$0xff] %v1579_v24 }
 0x50a   :  { %1587 = vsyncpa [#allocation3], 1 }

</bundles_post_ra>
